<compile_context>
chip_gen: v7x
topology: tpu7x:2x2x1
jax: 0.10.0
libtpu: 0.0.40
codegen_flags: <defaults>
</compile_context>

<pallas_src>
import functools

import jax
import jax.numpy as jnp
from jax.experimental import pallas as pl
from jax.experimental.pallas import tpu as pltpu


# ----------------------------------------------------------------------------
# Pallas kernel: per-pixel channel mixing (the 1x1 conv hot path)
# ----------------------------------------------------------------------------
def _conv1x1_kernel(w_ref, x_ref, o_ref):
    # w_ref: (C, C) conv weight W[c_out, c_in] (full, grid-invariant).
    # x_ref/o_ref: (nb, C, t_hw) tile — channels on sublanes, pixels on lanes.
    w = w_ref[...]
    nb = x_ref.shape[0]
    for b in range(nb):  # nb is small & static; each iter is a 2-D MXU matmul
        o_ref[b] = jnp.dot(
            w, x_ref[b], preferred_element_type=jnp.float32
        ).astype(o_ref.dtype)


def _choose_tiles(n_batch, c, hw, itemsize, *, tile_budget_bytes=4 << 20):
    """Pick (nb, t_hw) so each grid step moves ~tile_budget_bytes per buffer.

    The kernel is memory-bound, so the goal is the biggest tile that fits the
    VMEM budget (amortizes the ~0.35 us per-step overhead), with the lane axis
    (H*W) either full-extent or a multiple of 128.  Keeps >= 2 grid steps when
    possible so v7x's two TensorCores both get work.
    """
    per_batch = c * hw * itemsize
    if per_batch <= tile_budget_bytes:
        # Whole spatial extent of a batch element fits: fold batch elements.
        nb = max(1, min(n_batch, tile_budget_bytes // per_batch))
        if nb >= n_batch and n_batch >= 2:
            nb = pl.cdiv(n_batch, 2)  # give each TC (v7x) one step
        return int(nb), hw
    # One batch element per step; tile the spatial axis (multiple of 128).
    t_hw = (tile_budget_bytes // (c * itemsize)) // 128 * 128
    t_hw = max(128, min(t_hw, hw))
    return 1, int(t_hw)


def conv1x1_pallas(weight, x3, *, tile_budget_bytes=4 << 20):
    """weight: (C, C) float32; x3: (N, C, HW) float32.  Returns (N, C, HW).

    Partial blocks (last batch / spatial block) are safe because output
    element (n, :, p) depends only on input element (n, :, p): garbage lanes
    or batch rows in a padded input block never reach a stored output lane.
    """
    n_batch, c, hw = x3.shape
    itemsize = jnp.dtype(x3.dtype).itemsize
    nb, t_hw = _choose_tiles(n_batch, c, hw, itemsize,
                             tile_budget_bytes=tile_budget_bytes)
    grid = (pl.cdiv(n_batch, nb), pl.cdiv(hw, t_hw))

    # Double-buffered input + output tiles, plus the (tiny) weight.  Only
    # raise the scoped-VMEM limit when we actually need more than the 32 MiB
    # default, and stay under v7x's 64 MiB physical VMEM.
    tile_bytes = nb * c * t_hw * itemsize
    vmem_need = 4 * tile_bytes + 4 * c * c * itemsize + (2 << 20)
    vmem_limit = None if vmem_need <= (32 << 20) else min(vmem_need, 48 << 20)

    return pl.pallas_call(
        _conv1x1_kernel,
        out_shape=jax.ShapeDtypeStruct((n_batch, c, hw), x3.dtype),
        grid_spec=pltpu.PrefetchScalarGridSpec(
            num_scalar_prefetch=0,
            grid=grid,
            in_specs=[
                # Weight is grid-invariant (constant index_map): stays resident.
                pl.BlockSpec((c, c), lambda i, j: (0, 0)),
                # Activations: nb batch elements, all channels, t_hw pixels.
                pl.BlockSpec((nb, c, t_hw), lambda i, j: (i, 0, j)),
            ],
            out_specs=pl.BlockSpec((nb, c, t_hw), lambda i, j: (i, 0, j)),
        ),
        compiler_params=pltpu.CompilerParams(
            dimension_semantics=("parallel", "parallel"),
            vmem_limit_bytes=vmem_limit,
        ),
    )(weight, x3)


# ----------------------------------------------------------------------------
# InvConv2dLU parameter construction + forward (glue in plain JAX)
# ----------------------------------------------------------------------------
def init_invconv2dlu_params(key, in_channel):
    """Deterministic re-implementation of the module's __init__."""
    w0 = jax.random.normal(key, (in_channel, in_channel), dtype=jnp.float32)
    q, _ = jnp.linalg.qr(w0)
    # LU with partial pivoting: q = P @ L @ U
    w_p, w_l, w_u_full = jax.scipy.linalg.lu(q.astype(jnp.float32))
    w_s = jnp.diag(w_u_full)
    w_u = jnp.triu(w_u_full, 1)
    u_mask = jnp.triu(jnp.ones_like(w_u), 1)
    l_mask = u_mask.T
    return dict(
        w_p=w_p.astype(jnp.float32),
        u_mask=u_mask.astype(jnp.float32),
        l_mask=l_mask.astype(jnp.float32),
        s_sign=jnp.sign(w_s).astype(jnp.float32),
        l_eye=jnp.eye(in_channel, dtype=jnp.float32),
        w_l=w_l.astype(jnp.float32),
        w_s=jnp.log(jnp.abs(w_s)).astype(jnp.float32),
        w_u=w_u.astype(jnp.float32),
    )


def calc_weight(params, volume_norm=True):
    w_s = params["w_s"]
    if volume_norm:
        w_s = w_s - jnp.mean(w_s)
    lower = params["w_l"] * params["l_mask"] + params["l_eye"]
    upper = params["w_u"] * params["u_mask"] + jnp.diag(
        params["s_sign"] * jnp.exp(w_s)
    )
    return params["w_p"] @ lower @ upper  # (C_out, C_in) conv weight


@functools.partial(jax.jit, static_argnames=("volume_norm",))
def invconv2dlu_forward(params, x_nchw, volume_norm=True):
    """Forward pass: F.conv2d(input, weight) with a (C, C, 1, 1) kernel."""
    N, C, H, W = x_nchw.shape
    weight = calc_weight(params, volume_norm)       # (C_out, C_in)
    x3 = x_nchw.reshape(N, C, H * W)                # free reshape, stays NCHW
    out3 = conv1x1_pallas(weight, x3)               # (N, C, H*W)
    return out3.reshape(N, C, H, W)


# ----------------------------------------------------------------------------
if __name__ == "__main__":
    key = jax.random.PRNGKey(0)
    k_param, k_input = jax.random.split(key)

    N, C, H, W = 2, 4, 16, 16
    params = init_invconv2dlu_params(k_param, C)
    x = jax.random.normal(k_input, (N, C, H, W), dtype=jnp.float32)

    out = invconv2dlu_forward(params, x, volume_norm=True)
    out = jax.block_until_ready(out)

    # Reference check (pure-JAX 1x1 conv) to validate kernel semantics.
    weight_ref = calc_weight(params, True)
    ref = jnp.einsum("oc,nchw->nohw", weight_ref, x)
    assert out.shape == (N, C, H, W)
    assert jnp.allclose(out, ref, atol=1e-5, rtol=1e-5)

    print("KERNEL_OK")
</pallas_src>

<mosaic_0001>
module attributes {stable_mosaic.version = 11 : i64} {
  func.func @_conv1x1_kernel(%arg0: i32, %arg1: i32, %arg2: memref<4x4xf32, #tpu.memory_space<vmem>>, %arg3: memref<1x4x256xf32, #tpu.memory_space<vmem>>, %arg4: memref<1x4x256xf32, #tpu.memory_space<vmem>>) attributes {dimension_semantics = [#tpu.dimension_semantics<parallel>, #tpu.dimension_semantics<parallel>], iteration_bounds = array<i64: 2, 1>, scalar_prefetch = 0 : i64, scratch_operands = 0 : i64, tpu.core_type = #tpu.core_type<tc>, window_params = [{pipeline_mode = #tpu.pipeline_mode<synchronous>, transform_indices = @transform_0, window_bounds = array<i64: 4, 4>}, {transform_indices = @transform_1, window_bounds = array<i64: 1, 4, 256>}, {transform_indices = @transform_2, window_bounds = array<i64: 1, 4, 256>}]} {
    %c0 = arith.constant 0 : index
    %c0_0 = arith.constant 0 : index
    %0 = vector.load %arg2[%c0, %c0_0] : memref<4x4xf32, #tpu.memory_space<vmem>>, vector<4x4xf32>
    %c0_1 = arith.constant 0 : index
    %c0_2 = arith.constant 0 : index
    %c0_3 = arith.constant 0 : index
    %1 = vector.load %arg3[%c0_1, %c0_2, %c0_3] : memref<1x4x256xf32, #tpu.memory_space<vmem>>, vector<1x4x256xf32>
    %2 = vector.shape_cast %1 : vector<1x4x256xf32> to vector<4x256xf32>
    %cst = arith.constant dense<0.000000e+00> : vector<4x256xf32>
    %3 = tpu.matmul %0, %2, %cst {dimension_numbers = #tpu.dot_dimension_numbers<[1], [0], [0], [1], [0, 0, 1, 1], [], []>} : vector<4x4xf32>, vector<4x256xf32>, vector<4x256xf32> -> vector<4x256xf32>
    %c0_4 = arith.constant 0 : index
    %c0_5 = arith.constant 0 : index
    %c0_6 = arith.constant 0 : index
    %4 = vector.load %arg4[%c0_4, %c0_5, %c0_6] : memref<1x4x256xf32, #tpu.memory_space<vmem>>, vector<1x4x256xf32>
    %5 = vector.shape_cast %4 : vector<1x4x256xf32> to vector<4x256xf32>
    %6 = vector.shape_cast %3 : vector<4x256xf32> to vector<1x4x256xf32>
    tpu.vector_store %arg4[%c0_4, %c0_5, %c0_6], %6 {strides = array<i32>} : memref<1x4x256xf32, #tpu.memory_space<vmem>>, vector<1x4x256xf32>,
    return
  }
  func.func @transform_0(%arg0: i32, %arg1: i32) -> (i32, i32) {
    %c0_i32 = arith.constant 0 : i32
    %c0_i32_0 = arith.constant 0 : i32
    %c0_i32_1 = arith.constant 0 : i32
    return %c0_i32, %c0_i32_0 : i32, i32
  }
  func.func @transform_1(%arg0: i32, %arg1: i32) -> (i32, i32, i32) {
    %c0_i32 = arith.constant 0 : i32
    %c0_i32_0 = arith.constant 0 : i32
    return %arg0, %c0_i32, %arg1 : i32, i32, i32
  }
  func.func @transform_2(%arg0: i32, %arg1: i32) -> (i32, i32, i32) {
    %c0_i32 = arith.constant 0 : i32
    %c0_i32_0 = arith.constant 0 : i32
    return %arg0, %c0_i32, %arg1 : i32, i32, i32
  }
}

</mosaic_0001>

<bundles_post_ra>
// kernel: invconv2dlu_forward.1
= control target key start
LH: loop header
LB: loop body
LE: loop exit
PB: predicated region body
PF: predicated region fallthrough
CT: control target
= control target key end

     0   :  { %s441_s9 = smov 0   ;;  %s443_s10 = smov 0   ;;  %s474_s0 = inlined_call_operand.vmem [shape: f32[4,4], index: 0, kind: input, shape index: {}]   ;;  %s475_s1 = inlined_call_operand.vmem [shape: f32[2,4,256], index: 1, kind: input, shape index: {}]   ;;  %s476_s2 = inlined_call_operand.vmem [shape: f32[2,4,256], index: 2, kind: output, shape index: {}]  }
   0x1   :  { %s445_s11 = smov 0  }
   0x2 LB: > { %s24_s12 = sadd.s32 1, %s419_s10  ;;  %p363_p0 = scmp.ge.s32.totalorder %s423_s11, 1  ;;  %s423_s11 = sphi %s445_s11, %s12_s11   ;;  %s419_s10 = sphi %s443_s10, %s478_s10   ;;  %s415_s9 = sphi %s441_s9, %s477_s9  }
   0x3   : > { %p26_p1 = scmp.ge.s32.totalorder %s24_s12, 2  ;;  %p133_p2 = scmp.lt.s32.totalorder %s423_s11, 3 }
   0x5   : > { %s480_s12 = smov (%p26_p1, %s24_s12), 0  ;;  %p134_p3 = pnand %p363_p0, %p133_p2 }
   0x6   : > { %p164_p4 = scmp.lt.s32.totalorder (!%p134_p3), %s415_s9, 1  ;;  %v425_v0 = vmov (!%p134_p3), 0.0   ;;  %vm191_vm0 = vcmask (!%p134_p3), 1043456   ;;  %v183_v3 = vld [vmem:[%s474_s0] sm:$0xf] (!%p134_p3)  ;;  %vm187_vm1 = vcmask (!%p134_p3), 31744  }
   0x7   : > { %137 = sbr.rel (%p134_p3) target bundleno = 238 (0xee), region = 28  ;;  %260 = vmatprep.mubr.f32.mxu0 (!%p134_p3), %v425_v0 }
   0xe   : > { %s482_s9 = smov (!%p164_p4, %s415_s9), 1 }
   0xf   : > { %s373_s13 = sshll.u32 %s482_s9, 3 }
  0x10   : > { %s171_s16 = scalar_lea.vmem %s475_s1, %s373_s13  ;;  %s181_s21 = scalar_lea.vmem %s476_s2, %s373_s13 }
  0x11   : > { %v184_v1 = vld [vmem:[%s171_s16] sm:$0xff] }
  0x12   : > { %v186_v2 = vcombine.high %v184_v1, %v184_v1 }
  0x14   : > { %368 = vmatprep.subr.msk.mxu0 %vm191_vm0, %v186_v2 }
  0x15   : > { %369 = vmatpush1.msk.msra.mxu0 %vm191_vm0, %v184_v1 }
  0x16   : > { %370 = vmatmul.mubr.msk.f32.vlgmr.msra.gmra.mrb[0].mxu0 %vm187_vm1, %v183_v3 }
  0xe9   : > { %v262_v4 = vpop.f32.mrb[0].mxu0 }
  0xea   : > { %v264_v5 = vpop.f32.mrb[1].mxu0 }
  0xeb   : > { %v269_v6 = vcombine.low %v262_v4, %v264_v5 }
  0xed   : > { %271 = vst [vmem:[%s181_s21] sm:$0xff] %v269_v6 }
  0xee PF: > { %s12_s11 = sadd.s32 1, %s423_s11   ;;  %s477_s9 = smov %s419_s10 }
  0xef   : > { %p9_p5 = scmp.ge.s32.totalorder %s12_s11, 4   ;;  %s478_s10 = smov %s480_s12 }
  0xf1   :  { %11 = sbr.rel (!%p9_p5) target bundleno = 2 (0x2), region = 58 }

</bundles_post_ra>
